<compile_context>
chip_gen: v5e
topology: v5e:2x2
jax: 0.10.0
libtpu: 0.0.40
codegen_flags: <defaults>
</compile_context>

<pallas_src>
import functools

import jax
import jax.numpy as jnp
import numpy as np
from jax import lax
from jax.experimental import pallas as pl
from jax.experimental.pallas import tpu as pltpu


# ----------------------------------------------------------------------------
# Kernel A: fused amortization heads
#   y = h @ W_all + b_all, tanh applied only to the diag1/diag2 column range.
#   W_all is bf16 (halves weight HBM traffic), accumulation is f32 on the MXU.
# ----------------------------------------------------------------------------
def _fused_heads_kernel(x_ref, w_ref, b_ref, o_ref, *, tile_n, n_tanh):
    j = pl.program_id(0)
    y = jnp.dot(x_ref[...], w_ref[...], preferred_element_type=jnp.float32)
    y = y + b_ref[...]
    # global column index of each lane in this tile; tanh only on the diag1/diag2 columns
    gcol = j * tile_n + lax.broadcasted_iota(jnp.int32, y.shape, 1)
    y = jnp.where(gcol < n_tanh, jnp.tanh(y), y)
    o_ref[...] = y.astype(o_ref.dtype)


def fused_heads_pallas(x_bf16, w_all, b_all, *, n_tanh, tile_n=512):
    B, K = x_bf16.shape
    K2, N = w_all.shape
    assert K == K2 and N % tile_n == 0
    kernel = functools.partial(_fused_heads_kernel, tile_n=tile_n, n_tanh=n_tanh)
    return pl.pallas_call(
        kernel,
        out_shape=jax.ShapeDtypeStruct((B, N), jnp.float32),
        grid_spec=pltpu.PrefetchScalarGridSpec(
            num_scalar_prefetch=0,
            grid=(N // tile_n,),
            in_specs=[
                pl.BlockSpec((B, K), lambda j: (0, 0)),        # h stays resident in VMEM
                pl.BlockSpec((K, tile_n), lambda j: (0, j)),   # weights streamed tile-by-tile
                pl.BlockSpec((1, tile_n), lambda j: (0, j)),
            ],
            out_specs=pl.BlockSpec((B, tile_n), lambda j: (0, j)),
        ),
        compiler_params=pltpu.CompilerParams(dimension_semantics=("parallel",)),
    )(x_bf16, w_all, b_all.reshape(1, N))


# ----------------------------------------------------------------------------
# Kernel B: fused Householder orthogonalization + Sylvester flow chain.
#   One grid step handles a whole tile of batch rows; the chained Householder
#   products and the 4 flow steps run as batched einsums, so q_ortho never
#   leaves VMEM.  All math is f32.
# ----------------------------------------------------------------------------
def _flow_kernel(d1_ref, d2_ref, b_ref, fd_ref, v_ref, mu_ref, var_ref, eps_ref, o_ref):
    TB, F, dz, _ = fd_ref.shape
    H = v_ref.shape[2]

    row = lax.broadcasted_iota(jnp.int32, (dz, dz), 0)
    col = lax.broadcasted_iota(jnp.int32, (dz, dz), 1)
    upper = (col > row)[None]          # strict upper triangle
    lower = (row > col)[None]          # strict lower triangle
    diag = (row == col)[None]
    eye = (row == col).astype(jnp.float32)

    # --- Householder chain: Q[b, f] = prod_h ( I - 2 v_h v_h^T / ||v_h||^2 ) ---
    v = v_ref[...].reshape(TB * F, H, dz)                       # (N, H, dz), N = TB*F chains
    vn = v * lax.rsqrt(jnp.sum(v * v, axis=-1, keepdims=True))  # normalized (EUP rsqrt)
    q_acc = None
    for h in range(H):                                          # static unroll, H = 4
        vh = vn[:, h, :]                                        # (N, dz)
        a_h = eye[None] - 2.0 * vh[:, :, None] * vh[:, None, :]  # (N, dz, dz)
        q_acc = a_h if q_acc is None else jnp.einsum(
            "nij,njk->nik", q_acc, a_h, preferred_element_type=jnp.float32)
    q_ortho = q_acc.reshape(TB, F, dz, dz)                      # (TB, F, dz, dz)

    d1 = d1_ref[...]        # (TB, F, dz)
    d2 = d2_ref[...]
    bb = b_ref[...]
    fd = fd_ref[...]        # (TB, F, dz, dz)

    # z0 = mu + sqrt(var) * eps, kept as (TB, 1, dz) row-vectors for the batched GEMVs.
    z = (mu_ref[...] + jnp.sqrt(var_ref[...]) * eps_ref[...])[:, None, :]

    for k in range(F):      # static unroll, F = 4 (flows are inherently sequential)
        Dk = fd[:, k]                       # (TB, dz, dz)
        Qk = q_ortho[:, k]                  # (TB, dz, dz)
        d1k = d1[:, k:k + 1, :]             # (TB, 1, dz)
        d2k = d2[:, k:k + 1, :]
        bk = bb[:, k:k + 1, :]
        # r1   = strict_upper(D) with diag d1 ;  r2^T = strict_lower(D) with diag d2
        r1 = jnp.where(upper, Dk, 0.0) + jnp.where(diag, d1k, 0.0)
        r2t = jnp.where(lower, Dk, 0.0) + jnp.where(diag, d2k, 0.0)
        # z' = z + tanh(z Q r2^T + b) r1^T Q^T   (applied as chained batched vec-mats,
        #  so no Q@r matrix-matrix products and no in-loop transposes)
        zq = jnp.einsum("bqi,bij->bqj", z, Qk, preferred_element_type=jnp.float32)
        pre = jnp.einsum("bqi,bij->bqj", zq, r2t, preferred_element_type=jnp.float32) + bk
        t = jnp.tanh(pre)
        w = jnp.einsum("bqj,bij->bqi", t, r1, preferred_element_type=jnp.float32)
        upd = jnp.einsum("bqj,bij->bqi", w, Qk, preferred_element_type=jnp.float32)
        z = z + upd

    o_ref[...] = z[:, 0, :].astype(o_ref.dtype)


def flow_chain_pallas(d1, d2, bflow, fd, v, z_mu, z_var, eps):
    B, F, dz, _ = fd.shape
    H = v.shape[2]
    # batch tile: 8 rows per grid step when possible (fills sublanes, gives v7x's 2 TCs work);
    # otherwise the whole batch in a single step (keeps the (8,128) "or full dim" rule valid).
    TB = 8 if (B > 8 and B % 8 == 0) else B
    return pl.pallas_call(
        _flow_kernel,
        out_shape=jax.ShapeDtypeStruct((B, dz), z_mu.dtype),
        grid_spec=pltpu.PrefetchScalarGridSpec(
            num_scalar_prefetch=0,
            grid=(B // TB,),
            in_specs=[
                pl.BlockSpec((TB, F, dz), lambda i: (i, 0, 0)),
                pl.BlockSpec((TB, F, dz), lambda i: (i, 0, 0)),
                pl.BlockSpec((TB, F, dz), lambda i: (i, 0, 0)),
                pl.BlockSpec((TB, F, dz, dz), lambda i: (i, 0, 0, 0)),
                pl.BlockSpec((TB, F, H, dz), lambda i: (i, 0, 0, 0)),
                pl.BlockSpec((TB, dz), lambda i: (i, 0)),
                pl.BlockSpec((TB, dz), lambda i: (i, 0)),
                pl.BlockSpec((TB, dz), lambda i: (i, 0)),
            ],
            out_specs=pl.BlockSpec((TB, dz), lambda i: (i, 0)),
        ),
        compiler_params=pltpu.CompilerParams(dimension_semantics=("parallel",)),
    )(d1, d2, bflow, fd, v, z_mu, z_var, eps)


# ----------------------------------------------------------------------------
# One-time parameter preparation: permute weight columns so the fused-linear
# output already comes out in (B, F, dz[, dz]) order, concatenate all heads,
# pad to a multiple of the tile width, cast weights to bf16.
# ----------------------------------------------------------------------------
def prepare_params(params, *, dim_z, num_flows=4, num_householder=4, tile_n=512):
    dz, F, H = dim_z, num_flows, num_householder
    q_dim = params["Wd"].shape[0]
    n_vec = F * dz
    n_fd = F * dz * dz
    n_q = F * dz * H

    def perm_vec_head(W, b):
        # original columns indexed (d, f) [view (B, dz, F)] -> reorder to (f, d)
        Wp = W.reshape(q_dim, dz, F).transpose(0, 2, 1).reshape(q_dim, n_vec)
        bp = b.reshape(dz, F).transpose(1, 0).reshape(n_vec)
        return Wp, bp

    Wd1_p, bd1_p = perm_vec_head(params["Wd1"], params["bd1"])
    Wd2_p, bd2_p = perm_vec_head(params["Wd2"], params["bd2"])
    Wb_p, bb_p = perm_vec_head(params["Wb"], params["bb"])
    # full_d columns indexed (i, j, f) [view (B, dz, dz, F)] -> reorder to (f, i, j)
    Wd_p = params["Wd"].reshape(q_dim, dz, dz, F).transpose(0, 3, 1, 2).reshape(q_dim, n_fd)
    bd_p = params["bd"].reshape(dz, dz, F).transpose(2, 0, 1).reshape(n_fd)
    # amor_q keeps its native column order: its flat .view() semantics mix batch and columns,
    # so the (H, F, B, dz) regrouping is applied on the activation (tiny) in the wrapper.
    Wq, bq = params["Wq"], params["bq"]

    n_cols = 3 * n_vec + n_fd + n_q
    n_pad = (-n_cols) % tile_n
    W_all = jnp.concatenate(
        [Wd1_p, Wd2_p, Wb_p, Wd_p, Wq, jnp.zeros((q_dim, n_pad), jnp.float32)], axis=1)
    b_all = jnp.concatenate(
        [bd1_p, bd2_p, bb_p, bd_p, bq, jnp.zeros((n_pad,), jnp.float32)], axis=0)
    return {
        "W_all": W_all.astype(jnp.bfloat16),   # bf16 weights for the MXU (f32 accumulation)
        "b_all": b_all.astype(jnp.float32),
        "n_tanh": 2 * n_vec,                   # diag1 + diag2 columns get tanh
        "tile_n": tile_n,
        "dims": (dz, F, H),
    }


# ----------------------------------------------------------------------------
# Full forward
# ----------------------------------------------------------------------------
def flow_encoder_forward(prep, h, z_mu, z_var, eps):
    dz, F, H = prep["dims"]
    B = h.shape[0]
    n_vec = F * dz
    n_fd = F * dz * dz
    n_q = F * dz * H

    y = fused_heads_pallas(h.astype(jnp.bfloat16), prep["W_all"], prep["b_all"],
                           n_tanh=prep["n_tanh"], tile_n=prep["tile_n"])

    # Pure reshapes (layout already baked into the weight columns).
    d1 = y[:, 0:n_vec].reshape(B, F, dz)
    d2 = y[:, n_vec:2 * n_vec].reshape(B, F, dz)
    bflow = y[:, 2 * n_vec:3 * n_vec].reshape(B, F, dz)
    fd = y[:, 3 * n_vec:3 * n_vec + n_fd].reshape(B, F, dz, dz)
    q_lin = y[:, 3 * n_vec + n_fd:3 * n_vec + n_fd + n_q]
    # PyTorch: amor_q(h).view(-1, dz) ... .view(H, F, B, dz, dz) is a flat reinterpretation
    # of the (B, F*dz*H) buffer -> (H, F, B, dz); regroup per (batch, flow) chain.
    v = q_lin.reshape(H, F, B, dz).transpose(2, 1, 0, 3)          # (B, F, H, dz), tiny

    return flow_chain_pallas(d1, d2, bflow, fd, v, z_mu, z_var, eps)


# ----------------------------------------------------------------------------
# Pure-JAX reference (mirrors the PyTorch forward semantics, uses the ORIGINAL params)
# ----------------------------------------------------------------------------
def reference_forward(params, h, z_mu, z_var, eps, *, dim_z, num_flows=4, num_householder=4):
    B = h.shape[0]
    dz, F, H = dim_z, num_flows, num_householder
    lin = lambda x, W, b: x @ W + b
    full_d = lin(h, params["Wd"], params["bd"]).reshape(B, dz, dz, F)
    diag1 = jnp.tanh(lin(h, params["Wd1"], params["bd1"])).reshape(B, dz, F)
    diag2 = jnp.tanh(lin(h, params["Wd2"], params["bd2"])).reshape(B, dz, F)
    q_lin = lin(h, params["Wq"], params["bq"])
    bb = lin(h, params["Wb"], params["bb"]).reshape(B, 1, dz, F)

    triu = jnp.triu(jnp.ones((dz, dz), jnp.float32), k=1)[None, :, :, None]
    di = jnp.arange(dz)
    r1 = (full_d * triu).at[:, di, di, :].set(diag1)
    r2 = (jnp.transpose(full_d, (0, 2, 1, 3)) * triu).at[:, di, di, :].set(diag2)

    qf = q_lin.reshape(-1, dz)
    v = qf / jnp.linalg.norm(qf, axis=1, keepdims=True)
    amat = jnp.eye(dz, dtype=jnp.float32)[None] - 2.0 * v[:, :, None] * v[:, None, :]
    amat = amat.reshape(H, F, B, dz, dz)
    q_ortho = amat[0]
    for hh in range(1, H):
        q_ortho = q_ortho @ amat[hh]

    z = z_mu + jnp.sqrt(z_var) * eps
    for k in range(F):
        Q = q_ortho[k]
        R1, R2, bk = r1[..., k], r2[..., k], bb[..., k]
        qr2 = Q @ jnp.swapaxes(R2, 1, 2)
        qr1 = Q @ R1
        zk = z[:, None, :]
        pre = zk @ qr2 + bk
        z = (jnp.tanh(pre) @ jnp.swapaxes(qr1, 1, 2) + zk)[:, 0, :]
    return z


if __name__ == "__main__":
    B, dz, qdim, F, H = 2, 32, 512, 4, 4
    key = jax.random.PRNGKey(0)
    keys = jax.random.split(key, 16)
    s = float(1.0 / (qdim ** 0.5))

    def init_linear(kw, kb, nin, nout):
        W = jax.random.uniform(kw, (nin, nout), jnp.float32, -s, s)
        b = jax.random.uniform(kb, (nout,), jnp.float32, -s, s)
        return W, b

    params = {}
    params["Wd"], params["bd"] = init_linear(keys[0], keys[1], qdim, F * dz * dz)
    params["Wd1"], params["bd1"] = init_linear(keys[2], keys[3], qdim, F * dz)
    params["Wd2"], params["bd2"] = init_linear(keys[4], keys[5], qdim, F * dz)
    params["Wq"], params["bq"] = init_linear(keys[6], keys[7], qdim, F * dz * H)
    params["Wb"], params["bb"] = init_linear(keys[8], keys[9], qdim, F * dz)

    # Round the weight matrices and h to bf16-representable values once, so the bf16-MXU
    # kernel path and the f32 reference evaluate numerically identical parameters.
    bf16_round = lambda x: x.astype(jnp.bfloat16).astype(jnp.float32)
    for name in ("Wd", "Wd1", "Wd2", "Wq", "Wb"):
        params[name] = bf16_round(params[name])

    h = bf16_round(jax.random.normal(keys[10], (B, qdim), jnp.float32))
    z_mu = jax.random.normal(keys[11], (B, dz), jnp.float32)
    z_var = jax.random.uniform(keys[12], (B, dz), jnp.float32, 0.5, 1.5)
    eps = jax.random.normal(keys[13], (B, dz), jnp.float32)

    prep = prepare_params(params, dim_z=dz, num_flows=F, num_householder=H)
    z = flow_encoder_forward(prep, h, z_mu, z_var, eps)
    z = jax.block_until_ready(z)

    z_ref = reference_forward(params, h, z_mu, z_var, eps,
                              dim_z=dz, num_flows=F, num_householder=H)
    np.testing.assert_allclose(np.asarray(z), np.asarray(z_ref), rtol=3e-2, atol=3e-2)
    print("KERNEL_OK")
</pallas_src>

<mosaic_0001>
module attributes {stable_mosaic.version = 11 : i64} {
  func.func @_fused_heads_kernel(%arg0: i32, %arg1: memref<2x512xbf16, #tpu.memory_space<vmem>>, %arg2: memref<512x512xbf16, #tpu.memory_space<vmem>>, %arg3: memref<1x512xf32, #tpu.memory_space<vmem>>, %arg4: memref<2x512xf32, #tpu.memory_space<vmem>>) attributes {dimension_semantics = [#tpu.dimension_semantics<parallel>], iteration_bounds = array<i64: 10>, scalar_prefetch = 0 : i64, scratch_operands = 0 : i64, tpu.core_type = #tpu.core_type<tc>, window_params = [{pipeline_mode = #tpu.pipeline_mode<synchronous>, transform_indices = @transform_0, window_bounds = array<i64: 2, 512>}, {transform_indices = @transform_1, window_bounds = array<i64: 512, 512>}, {transform_indices = @transform_2, window_bounds = array<i64: 1, 512>}, {transform_indices = @transform_3, window_bounds = array<i64: 2, 512>}]} {
    %c0 = arith.constant 0 : index
    %c0_0 = arith.constant 0 : index
    %0 = vector.load %arg1[%c0, %c0_0] : memref<2x512xbf16, #tpu.memory_space<vmem>>, vector<2x512xbf16>
    %c0_1 = arith.constant 0 : index
    %c0_2 = arith.constant 0 : index
    %1 = vector.load %arg2[%c0_1, %c0_2] : memref<512x512xbf16, #tpu.memory_space<vmem>>, vector<512x512xbf16>
    %cst = arith.constant dense<0.000000e+00> : vector<2x512xf32>
    %2 = tpu.matmul %0, %1, %cst {dimension_numbers = #tpu.dot_dimension_numbers<[1], [0], [0], [1], [0, 0, 1, 1], [], []>} : vector<2x512xbf16>, vector<512x512xbf16>, vector<2x512xf32> -> vector<2x512xf32>
    %c0_3 = arith.constant 0 : index
    %c0_4 = arith.constant 0 : index
    %3 = vector.load %arg3[%c0_3, %c0_4] : memref<1x512xf32, #tpu.memory_space<vmem>>, vector<1x512xf32>
    %4 = vector.broadcast %3 : vector<1x512xf32> to vector<2x512xf32>
    %5 = arith.addf %2, %4 : vector<2x512xf32>
    %c512_i32 = arith.constant 512 : i32
    %6 = arith.muli %arg0, %c512_i32 : i32
    %7 = tpu.iota {dimensions = array<i32: 1>} : vector<2x512xi32>
    %8 = vector.broadcast %6 : i32 to vector<2x512xi32>
    %9 = arith.addi %8, %7 : vector<2x512xi32>
    %c256_i32 = arith.constant 256 : i32
    %10 = vector.broadcast %c256_i32 : i32 to vector<2x512xi32>
    %11 = arith.cmpi slt, %9, %10 : vector<2x512xi32>
    %12 = math.tanh %5 : vector<2x512xf32>
    %13 = arith.select %11, %12, %5 : vector<2x512xi1>, vector<2x512xf32>
    %c0_5 = arith.constant 0 : index
    %c0_6 = arith.constant 0 : index
    %14 = vector.load %arg4[%c0_5, %c0_6] : memref<2x512xf32, #tpu.memory_space<vmem>>, vector<2x512xf32>
    tpu.vector_store %arg4[%c0_5, %c0_6], %13 {strides = array<i32>} : memref<2x512xf32, #tpu.memory_space<vmem>>, vector<2x512xf32>,
    return
  }
  func.func @transform_0(%arg0: i32) -> (i32, i32) {
    %c0_i32 = arith.constant 0 : i32
    %c0_i32_0 = arith.constant 0 : i32
    %c0_i32_1 = arith.constant 0 : i32
    return %c0_i32, %c0_i32_0 : i32, i32
  }
  func.func @transform_1(%arg0: i32) -> (i32, i32) {
    %c0_i32 = arith.constant 0 : i32
    %c0_i32_0 = arith.constant 0 : i32
    return %c0_i32, %arg0 : i32, i32
  }
  func.func @transform_2(%arg0: i32) -> (i32, i32) {
    %c0_i32 = arith.constant 0 : i32
    %c0_i32_0 = arith.constant 0 : i32
    return %c0_i32, %arg0 : i32, i32
  }
  func.func @transform_3(%arg0: i32) -> (i32, i32) {
    %c0_i32 = arith.constant 0 : i32
    %c0_i32_0 = arith.constant 0 : i32
    return %c0_i32, %arg0 : i32, i32
  }
}

</mosaic_0001>

<bundles_post_ra>
// kernel: tpu_custom_call.1
= control target key start
LH: loop header
LB: loop body
LE: loop exit
PB: predicated region body
PF: predicated region fallthrough
CT: control target
= control target key end

     0   :  { %s2778_s0 = inlined_call_operand.hbm [shape: bf16[2,512], index: 0, kind: input, shape index: {}]   ;;  %s2779_s1 = inlined_call_operand.hbm [shape: bf16[512,5120], index: 1, kind: input, shape index: {}]   ;;  %s2780_s2 = inlined_call_operand.hbm [shape: f32[1,5120], index: 2, kind: input, shape index: {}]   ;;  %s2781_s3 = inlined_call_operand.hbm [shape: f32[2,5120], index: 3, kind: output, shape index: {}]  }
   0x1   :  { %2782 = sst [smem:[#allocation12_spill]] %s2778_s0 }
   0x2   :  { %8 = vsyncpa [#allocation3], 0 }
   0x3   :  { %9 = vsyncpa [#allocation6], 0 }
   0x4   :  { %11 = vsyncpa [#allocation6 + $0x1], 0 }
   0x5   :  { %12 = vsyncpa [#allocation4], 0 }
   0x6   :  { %14 = vsyncpa [#allocation4 + $0x1], 0  ;;  %s2320_s12 = smov 0   ;;  %s2322_s13 = smov 0  }
   0x7   :  { %s2324_s14 = smov 0   ;;  %s2326_s15 = smov 0  }
   0x8 LB: > { %s2341_s16 = sadd.s32 1, %s2294_s15   ;;  %s48_s17 = sadd.s32 1, %s2290_s14  ;;  %s2294_s15 = sphi %s2326_s15, %s2792_s15   ;;  %s2290_s14 = sphi %s2324_s14, %s2791_s14   ;;  %s2286_s13 = sphi %s2322_s13, %s2790_s13   ;;  %s2282_s12 = sphi %s2320_s12, %s2789_s12  }
   0x9   : > { %s45_s18 = ssub.s32 %s2294_s15, %s2341_s16  ;;  %p55_p0 = scmp.ne.s32.totalorder %s2290_s14, %s2286_s13 }
   0xa   : > { %p46_p1 = scmp.eq.s32.totalorder %s45_s18, 0  ;;  %p56_p2 = scmp.eq.s32.totalorder %s2294_s15, 0 }
   0xb   : > { %p2087_p3 = scmp.lt.s32.totalorder %s2294_s15, 10  ;;  %s149_s20 = sand.u32 1, %s2294_s15  }
   0xc   : > { %s2351_s19 = scalar_select %p46_p1, %s2290_s14, %s48_s17  }
   0xd   : > { %p57_p4 = por %p56_p2, %p55_p0  ;;  %s151_s21 = sand.u32 1, %s2290_s14  }
   0xe   : > { %s1403_s22 = sshll.u32 %s151_s21, 10  ;;  %s1931_s23 = sshll.u32 %s2294_s15, 4 }
   0xf   : > { %s158_s26 = scalar_lea.hbm %s2779_s1, %s1931_s23  ;;  %s153_s28 = scalar_lea.vmem [#allocation5], %s1403_s22 }
  0x10   : > { %s159_s27 = sshll.u32 %s158_s26, 4  ;;  %s161_s29 = sshll.u32 %s153_s28, 4  ;;  %s160_s27 = int_to_ptr.hbm [resolvable:$true] %s159_s27  ;;  %s162_s29 = int_to_ptr.vmem [resolvable:$true] %s161_s29 }
  0x11   : > { %p2366_p5 = pnand %p2087_p3, %p57_p4  ;;  %s2370_s4 = scalar_lea.sflag [#allocation6], %s149_s20 }
  0x12   : > { %s2134_s5 = sshra.s32 %s160_s27, 4  ;;  %s2141_s9 = scalar_lea.hbm %s2779_s1, 10240  ;;  %s2135_s5 = int_to_ptr.hbm [resolvable:$true] %s2134_s5 }
  0x13   : > { %s2136_s6 = scalar_lea.hbm %s2135_s5, 1024  ;;  %p2138_p7 = pneg %p2366_p5 }
  0x14   : > { %p2137_p6 = scmp.ne.s32.totalorder %s2135_s5, %s2136_s6  ;;  %p2142_p10 = scmp.lt.s32.totalorder %s2135_s5, %s2779_s1 }
  0x15   : > { %p2143_p11 = scmp.lt.s32.totalorder %s2141_s9, %s2136_s6 }
  0x16   : > { %p2139_p8 = pnand %p2138_p7, %p2137_p6 }
  0x17   : > { %p2144_p12 = por %p2143_p11, %p2142_p10 }
  0x18   : > { %p2140_p9 = pneg %p2139_p8 }
  0x1a   : > { %p2145_p13 = pnand %p2144_p12, %p2140_p9 }
  0x1c   : > { %2148 = shalt.err (!%p2145_p13)
}
  0x1d   : > { %s2296_s17 = smov 2560   ;;  %s2297_s18 = smov 256  }
  0x1e   : > { %s2298_s20 = smov 16   ;;  %s2387_s22 = sadd.s32 4294967295, %s2294_s15  }
  0x1f   : > { %2078 = dma.hbm_to_vmem [thread:$0]  (!%p2366_p5), %s160_s27, 16384, %s162_s29, %s2370_s4, %s2296_s17, %s2297_s18, %s2298_s20  }
  0x20   : > { %s1399_s23 = sadd.s32 4294967294, %s2294_s15   ;;  %p61_p1 = scmp.ne.s32.totalorder %s2286_s13, %s2282_s12 }
  0x21   : > { %p62_p2 = scmp.eq.s32.totalorder %s2387_s22, 0  ;;  %p111_p3 = scmp.eq.s32.totalorder %s2387_s22, 9 }
  0x22   : > { %p117_p4 = scmp.eq.s32.totalorder %s1399_s23, 9  ;;  %p1400_p6 = scmp.ge.s32.totalorder %s2294_s15, 1 }
  0x23   : > { %p2397_p8 = por %p62_p2, %p61_p1  ;;  %p2404_p9 = por %p111_p3, %p55_p0 }
  0x24   : > { %p2408_p10 = por %p117_p4, %p61_p1  ;;  %p124_p11 = scmp.lt.s32.totalorder %s2294_s15, 11 }
  0x25   : > { %s2787_s0 = sld [smem:[#allocation12_spill]]  ;;  %s1406_s6 = sshll.u32 %s151_s21, 2 }
  0x26   : > { %p2416_p12 = pnand %p1400_p6, %p124_p11  ;;  %s2299_s7 = smov [#allocation2]  }
  0x27   : > { %s138_s8 = sshll.u32 %s2299_s7, 4  ;;  %s1407_s9 = sshll.u32 %s2294_s15, 2  ;;  %s139_s8 = int_to_ptr.vmem [resolvable:$true] %s138_s8 }
  0x28   : > { %p2071_p0 = pneg %p2416_p12  ;;  %s179_s17 = scalar_lea.hbm %s2780_s2, %s1407_s9 }
  0x29   : > { %s175_s18 = scalar_lea.vmem [#allocation7], %s1406_s6  ;;  %s181_s23 = sshll.u32 %s179_s17, 4  ;;  %s182_s23 = int_to_ptr.hbm [resolvable:$true] %s181_s23 }
  0x2a   : > { %p2072_p13 = pnand %p2071_p0, %p62_p2  ;;  %s183_s20 = sshll.u32 %s175_s18, 4  ;;  %s184_s20 = int_to_ptr.vmem [resolvable:$true] %s183_s20 }
  0x2b   : > { %s136_s29 = sshll.u32 %s2787_s0, 4  ;;  %s2194_s21 = sshra.s32 %s182_s23, 4  ;;  %s137_s29 = int_to_ptr.hbm [resolvable:$true] %s136_s29  ;;  %s2195_s21 = int_to_ptr.hbm [resolvable:$true] %s2194_s21 }
  0x2c   : > { %2074 = dma.hbm_to_vmem [thread:$0]  (!%p2072_p13), %s137_s29, 64, %s139_s8, [#allocation3]  }
  0x2d   : > { %s2196_s27 = scalar_lea.hbm %s2195_s21, 4  ;;  %s2201_s0 = scalar_lea.hbm %s2780_s2, 40 }
  0x2e   : > { %p2197_p1 = scmp.ne.s32.totalorder %s2195_s21, %s2196_s27  ;;  %p2202_p6 = scmp.lt.s32.totalorder %s2195_s21, %s2780_s2 }
  0x2f   : > { %p2203_p11 = scmp.lt.s32.totalorder %s2201_s0, %s2196_s27 }
  0x30   : > { %p2199_p3 = pnand %p2197_p1, %p2138_p7 }
  0x31   : > { %p2204_p0 = por %p2203_p11, %p2202_p6 }
  0x32   : > { %p2200_p4 = pneg %p2199_p3 }
  0x34   : > { %p2205_p13 = pnand %p2204_p0, %p2200_p4 }
  0x36   : > { %2208 = shalt.err (!%p2205_p13)
}
  0x37   : > { %2081 = dma.hbm_to_vmem [thread:$0]  (!%p2366_p5), %s182_s23, 64, %s184_s20, %s2370_s4  }
  0x38   : > { %192 = sbr.rel (%p2416_p12) target bundleno = 349 (0x15d), region = 32 }
  0x3d   : > { %2269 = dma.done.wait (%p62_p2), [#allocation3], 64  }
  0x3e   : > { %2271 = vsyncadd (%p62_p2), [#allocation3], 4294967232  ;;  %s199_s0 = sand.u32 1, %s2387_s22   ;;  %s2450_s29 = sand.u32 1, %s2286_s13  }
  0x3f   : > { %s1410_s6 = sshll.u32 %s2450_s29, 10  ;;  %s200_s30 = scalar_lea.sflag [#allocation6], %s199_s0 }
  0x40   : > { %s2453_s8 = scalar_lea.vmem [#allocation5], %s1410_s6 }
  0x41   : > { %2273 = dma.done.wait (%p2397_p8), %s200_s30, 16448  }
  0x42   : > { %2275 = vsyncadd (%p2397_p8), %s200_s30, 4294950848  ;;  %v1527_v0 = vld [vmem:[%s2453_s8 + $0xe0] sm:$0xf]  ;;  %v1962_v1 = vld [vmem:[%s2453_s8 + $0xec] sm:$0xf0]  ;;  %s1411_s4 = sshll.u32 %s2450_s29, 2 }
  0x43   : > { %v1655_v2 = vld [vmem:[%s2453_s8 + $0x1e0] sm:$0xf]  ;;  %v1528_v3 = vor.u32 %v1962_v1, %v1527_v0  ;;  %v1994_v4 = vld [vmem:[%s2453_s8 + $0x1ec] sm:$0xf0]  ;;  %s213_s24 = scalar_lea.vmem [#allocation7], %s1411_s4  ;;  %s1925_s5 = sshll.u32 %s2387_s22, 9 }
  0x44   : > { %v1783_v5 = vld [vmem:[%s2453_s8 + $0x2e0] sm:$0xf]  ;;  %v2026_v6 = vld [vmem:[%s2453_s8 + $0x2ec] sm:$0xf0]  ;;  %v1656_v7 = vor.u32 %v1994_v4, %v1655_v2  ;;  %s1412_s11 = sshll.u32 %s2450_s29, 3  ;;  %s2060_s17 = sshll.u32 %s2387_s22, 3 }
  0x45   : > { %v1784_v8 = vor.u32 %v2026_v6, %v1783_v5  ;;  %v1911_v9 = vld [vmem:[%s2453_s8 + $0x3e0] sm:$0xf]  ;;  %v2058_v10 = vld [vmem:[%s2453_s8 + $0x3ec] sm:$0xf0]  ;;  %1034 = vmatpush.bf16.msra.mxu0 %v1528_v3  ;;  %s1292_s23 = scalar_lea.hbm %s2781_s3, %s2060_s17  ;;  %vm1272_vm4 = vcmask 1041408   ;;  %vm1274_vm5 = vcmask 1045508  }
  0x46   : > { %v1511_v11 = vld [vmem:[%s2453_s8 + $0xc0] sm:$0xf]  ;;  %v1912_v12 = vor.u32 %v2058_v10, %v1911_v9  ;;  %v1958_v13 = vld [vmem:[%s2453_s8 + $0xcc] sm:$0xf0]  ;;  %1047 = vmatpush.bf16.msra.mxu1 %v1656_v7  ;;  %s241_s22 = scalar_lea.vmem [#allocation8], %s1412_s11  ;;  %s1296_s27 = sshll.u32 %s1292_s23, 4  ;;  %s1297_s27 = int_to_ptr.hbm [resolvable:$true] %s1296_s27 }
  0x47   : > { %v1639_v14 = vld [vmem:[%s2453_s8 + $0x1c0] sm:$0xf]  ;;  %v1990_v15 = vld [vmem:[%s2453_s8 + $0x1cc] sm:$0xf0]  ;;  %1060 = vmatpush.bf16.msra.mxu2 %v1784_v8  ;;  %v1512_v16 = vor.u32 %v1958_v13, %v1511_v11  ;;  %s1294_s21 = sshll.u32 %s241_s22, 4  ;;  %vm1276_vm6 = vcmask 1043456   ;;  %s1295_s21 = int_to_ptr.vmem [resolvable:$true] %s1294_s21 }
  0x48   : > { %v1640_v17 = vor.u32 %v1990_v15, %v1639_v14  ;;  %v1767_v18 = vld [vmem:[%s2453_s8 + $0x2c0] sm:$0xf]  ;;  %v2022_v19 = vld [vmem:[%s2453_s8 + $0x2cc] sm:$0xf0]  ;;  %1073 = vmatpush.bf16.msra.mxu3 %v1912_v12  ;;  %s1281_s28 = scalar_lea.sflag [#allocation4], %s2450_s29  ;;  %s2238_s7 = sshra.s32 %s1297_s27, 4  ;;  %s2239_s7 = int_to_ptr.hbm [resolvable:$true] %s2238_s7 }
  0x49   : > { %v1895_v20 = vld [vmem:[%s2453_s8 + $0x3c0] sm:$0xf]  ;;  %v1768_v21 = vor.u32 %v2022_v19, %v1767_v18  ;;  %v2054_v22 = vld [vmem:[%s2453_s8 + $0x3cc] sm:$0xf0]  ;;  %1035 = vmatpush.bf16.msra.mxu0 %v1512_v16  ;;  %s2240_s10 = scalar_lea.hbm %s2239_s7, 8  ;;  %s2244_s6 = scalar_lea.hbm %s2781_s3, 80 }
  0x4a   : > { %v1495_v23 = vld [vmem:[%s2453_s8 + $0xa0] sm:$0xf]  ;;  %v1954_v24 = vld [vmem:[%s2453_s8 + $0xac] sm:$0xf0]  ;;  %v1896_v25 = vor.u32 %v2054_v22, %v1895_v20  ;;  %1048 = vmatpush.bf16.msra.mxu1 %v1640_v17  ;;  %p2241_p5 = scmp.ne.s32.totalorder %s2239_s7, %s2240_s10  ;;  %p2245_p8 = scmp.lt.s32.totalorder %s2239_s7, %s2781_s3 }
  0x4b   : > { %v1623_v26 = vld [vmem:[%s2453_s8 + $0x1a0] sm:$0xf]  ;;  %v1986_v27 = vld [vmem:[%s2453_s8 + $0x1ac] sm:$0xf0]  ;;  %v1496_v29 = vor.u32 %v1954_v24, %v1495_v23  ;;  %1061 = vmatpush.bf16.msra.mxu2 %v1768_v21  ;;  %p2246_p12 = scmp.lt.s32.totalorder %s2244_s6, %s2240_s10 }
  0x4c   : > { %v1751_v28 = vld [vmem:[%s2453_s8 + $0x2a0] sm:$0xf]  ;;  %v2018_v30 = vld [vmem:[%s2453_s8 + $0x2ac] sm:$0xf0]  ;;  %v1624_v33 = vor.u32 %v1986_v27, %v1623_v26  ;;  %1074 = vmatpush.bf16.msra.mxu3 %v1896_v25  ;;  %p2242_p7 = pnand %p2241_p5, %p2404_p9 }
  0x4d   : > { %v1879_v31 = vld [vmem:[%s2453_s8 + $0x3a0] sm:$0xf]  ;;  %v2050_v32 = vld [vmem:[%s2453_s8 + $0x3ac] sm:$0xf0]  ;;  %v1752_v34 = vor.u32 %v2018_v30, %v1751_v28  ;;  %1036 = vmatpush.bf16.msra.mxu0 %v1496_v29  ;;  %v1960_v28 = vld [vmem:[%s2453_s8 + $0xe4] sm:$0xf]  ;;  %p2247_p1 = por %p2246_p12, %p2245_p8 }
  0x4e   : > { %v1479_v35 = vld [vmem:[%s2453_s8 + $0x80] sm:$0xf]  ;;  %v1950_v36 = vld [vmem:[%s2453_s8 + $0x8c] sm:$0xf0]  ;;  %v1880_v38 = vor.u32 %v2050_v32, %v1879_v31  ;;  %1049 = vmatpush.bf16.msra.mxu1 %v1624_v33  ;;  %v1529_v29 = vld [vmem:[%s2453_s8 + $0xf0] sm:$0xf0]  ;;  %p2243_p2 = pneg %p2242_p7 }
  0x4f   : > { %v1607_v37 = vld [vmem:[%s2453_s8 + $0x180] sm:$0xf]  ;;  %v1982_v39 = vld [vmem:[%s2453_s8 + $0x18c] sm:$0xf0]  ;;  %v1480_v44 = vor.u32 %v1950_v36, %v1479_v35  ;;  %1062 = vmatpush.bf16.msra.mxu2 %v1752_v34  ;;  %v1992_v30 = vld [vmem:[%s2453_s8 + $0x1e4] sm:$0xf] }
  0x50   : > { %v1735_v40 = vld [vmem:[%s2453_s8 + $0x280] sm:$0xf]  ;;  %v2014_v41 = vld [vmem:[%s2453_s8 + $0x28c] sm:$0xf0]  ;;  %v1608_v45 = vor.u32 %v1982_v39, %v1607_v37  ;;  %1075 = vmatpush.bf16.msra.mxu3 %v1880_v38  ;;  %v1657_v32 = vld [vmem:[%s2453_s8 + $0x1f0] sm:$0xf0]  ;;  %p2248_p3 = pnand %p2247_p1, %p2243_p2 }
  0x51   : > { %v1863_v42 = vld [vmem:[%s2453_s8 + $0x380] sm:$0xf]  ;;  %v2046_v43 = vld [vmem:[%s2453_s8 + $0x38c] sm:$0xf0]  ;;  %v1736_v46 = vor.u32 %v2014_v41, %v1735_v40  ;;  %1037 = vmatpush.bf16.msra.mxu0 %v1480_v44  ;;  %v2024_v33 = vld [vmem:[%s2453_s8 + $0x2e4] sm:$0xf]  ;;  %v1532_v40 = vor.u32 %v1960_v28, %v1529_v29  ;;  %v1660_v41 = vor.u32 %v1992_v30, %v1657_v32 }
  0x52   : > { %v1463_v47 = vld [vmem:[%s2453_s8 + $0x60] sm:$0xf]  ;;  %v1946_v48 = vld [vmem:[%s2453_s8 + $0x6c] sm:$0xf0]  ;;  %v1864_v50 = vor.u32 %v2046_v43, %v1863_v42  ;;  %1050 = vmatpush.bf16.msra.mxu1 %v1608_v45  ;;  %v1785_v34 = vld [vmem:[%s2453_s8 + $0x2f0] sm:$0xf0] }
  0x53   : > { %v1591_v49 = vld [vmem:[%s2453_s8 + $0x160] sm:$0xf]  ;;  %v1978_v51 = vld [vmem:[%s2453_s8 + $0x16c] sm:$0xf0]  ;;  %v1464_v56 = vor.u32 %v1946_v48, %v1463_v47  ;;  %1063 = vmatpush.bf16.msra.mxu2 %v1736_v46  ;;  %v2056_v37 = vld [vmem:[%s2453_s8 + $0x3e4] sm:$0xf]  ;;  %v1788_v42 = vor.u32 %v2024_v33, %v1785_v34 }
  0x54   : > { %v1719_v52 = vld [vmem:[%s2453_s8 + $0x260] sm:$0xf]  ;;  %v2010_v53 = vld [vmem:[%s2453_s8 + $0x26c] sm:$0xf0]  ;;  %v1592_v57 = vor.u32 %v1978_v51, %v1591_v49  ;;  %1076 = vmatpush.bf16.msra.mxu3 %v1864_v50  ;;  %v1913_v38 = vld [vmem:[%s2453_s8 + $0x3f0] sm:$0xf0] }
  0x55   : > { %v1847_v54 = vld [vmem:[%s2453_s8 + $0x360] sm:$0xf]  ;;  %v2042_v55 = vld [vmem:[%s2453_s8 + $0x36c] sm:$0xf0]  ;;  %v1720_v58 = vor.u32 %v2010_v53, %v1719_v52  ;;  %1038 = vmatpush.bf16.msra.mxu0 %v1464_v56  ;;  %v1956_v43 = vld [vmem:[%s2453_s8 + $0xc4] sm:$0xf]  ;;  %v1916_v46 = vor.u32 %v2056_v37, %v1913_v38 }
  0x56   : > { %v1447_v59 = vld [vmem:[%s2453_s8 + $0x40] sm:$0xf]  ;;  %v1942_v60 = vld [vmem:[%s2453_s8 + $0x4c] sm:$0xf0]  ;;  %v1848_v62 = vor.u32 %v2042_v55, %v1847_v54  ;;  %1051 = vmatpush.bf16.msra.mxu1 %v1592_v57  ;;  %v1513_v44 = vld [vmem:[%s2453_s8 + $0xd0] sm:$0xf0] }
  0x57   : > { %v1575_v61 = vld [vmem:[%s2453_s8 + $0x140] sm:$0xf]  ;;  %v1974_v63 = vld [vmem:[%s2453_s8 + $0x14c] sm:$0xf0]  ;;  %v1448_v4 = vor.u32 %v1942_v60, %v1447_v59  ;;  %1064 = vmatpush.bf16.msra.mxu2 %v1720_v58  ;;  %v1988_v45 = vld [vmem:[%s2453_s8 + $0x1c4] sm:$0xf]  ;;  %v1516_v53 = vor.u32 %v1956_v43, %v1513_v44 }
  0x58   : > { %v1703_v0 = vld [vmem:[%s2453_s8 + $0x240] sm:$0xf]  ;;  %v2006_v1 = vld [vmem:[%s2453_s8 + $0x24c] sm:$0xf0]  ;;  %v1576_v5 = vor.u32 %v1974_v63, %v1575_v61  ;;  %1077 = vmatpush.bf16.msra.mxu3 %v1848_v62  ;;  %v1641_v47 = vld [vmem:[%s2453_s8 + $0x1d0] sm:$0xf0] }
  0x59   : > { %v1831_v2 = vld [vmem:[%s2453_s8 + $0x340] sm:$0xf]  ;;  %v2038_v3 = vld [vmem:[%s2453_s8 + $0x34c] sm:$0xf0]  ;;  %v1704_v6 = vor.u32 %v2006_v1, %v1703_v0  ;;  %1039 = vmatpush.bf16.msra.mxu0 %v1448_v4  ;;  %v2020_v48 = vld [vmem:[%s2453_s8 + $0x2c4] sm:$0xf]  ;;  %v1644_v54 = vor.u32 %v1988_v45, %v1641_v47 }
  0x5a   : > { %v1431_v7 = vld [vmem:[%s2453_s8 + $0x20] sm:$0xf]  ;;  %v1938_v8 = vld [vmem:[%s2453_s8 + $0x2c] sm:$0xf0]  ;;  %v1832_v10 = vor.u32 %v2038_v3, %v1831_v2  ;;  %1052 = vmatpush.bf16.msra.mxu1 %v1576_v5  ;;  %v1769_v49 = vld [vmem:[%s2453_s8 + $0x2d0] sm:$0xf0] }
  0x5b   : > { %v1559_v9 = vld [vmem:[%s2453_s8 + $0x120] sm:$0xf]  ;;  %v1970_v11 = vld [vmem:[%s2453_s8 + $0x12c] sm:$0xf0]  ;;  %v1432_v16 = vor.u32 %v1938_v8, %v1431_v7  ;;  %1065 = vmatpush.bf16.msra.mxu2 %v1704_v6  ;;  %v2052_v50 = vld [vmem:[%s2453_s8 + $0x3c4] sm:$0xf]  ;;  %v1772_v55 = vor.u32 %v2020_v48, %v1769_v49 }
  0x5c   : > { %v1687_v12 = vld [vmem:[%s2453_s8 + $0x220] sm:$0xf]  ;;  %v2002_v13 = vld [vmem:[%s2453_s8 + $0x22c] sm:$0xf0]  ;;  %v1560_v19 = vor.u32 %v1970_v11, %v1559_v9  ;;  %1078 = vmatpush.bf16.msra.mxu3 %v1832_v10  ;;  %v1897_v51 = vld [vmem:[%s2453_s8 + $0x3d0] sm:$0xf0] }
  0x5d   : > { %v1815_v14 = vld [vmem:[%s2453_s8 + $0x320] sm:$0xf]  ;;  %v2034_v15 = vld [vmem:[%s2453_s8 + $0x32c] sm:$0xf0]  ;;  %v1688_v20 = vor.u32 %v2002_v13, %v1687_v12  ;;  %1040 = vmatpush.bf16.msra.mxu0 %v1432_v16  ;;  %v245_v52 = vld [vmem:[#allocation2] sm:$0xf]  ;;  %v1900_v59 = vor.u32 %v2052_v50, %v1897_v51 }
  0x5e   : > { %v1415_v17 = vld [vmem:[%s2453_s8] sm:$0xf]  ;;  %v1934_v18 = vld [vmem:[%s2453_s8 + $0xc] sm:$0xf0]  ;;  %v1816_v24 = vor.u32 %v2034_v15, %v1815_v14  ;;  %1053 = vmatpush.bf16.msra.mxu1 %v1560_v19  ;;  %385 = vst [vmem:[#allocation1] ss:$9 sm:$0xff] %v245_v52 }
  0x5f   : > { %v1543_v21 = vld [vmem:[%s2453_s8 + $0x100] sm:$0xf]  ;;  %v1966_v22 = vld [vmem:[%s2453_s8 + $0x10c] sm:$0xf0]  ;;  %v1416_v31 = vor.u32 %v1934_v18, %v1415_v17  ;;  %1066 = vmatpush.bf16.msra.mxu2 %v1688_v20  ;;  %v1952_v56 = vld [vmem:[%s2453_s8 + $0xa4] sm:$0xf] }
  0x60   : > { %v1671_v23 = vld [vmem:[%s2453_s8 + $0x200] sm:$0xf]  ;;  %v1998_v25 = vld [vmem:[%s2453_s8 + $0x20c] sm:$0xf0]  ;;  %v1544_v35 = vor.u32 %v1966_v22, %v1543_v21  ;;  %1079 = vmatpush.bf16.msra.mxu3 %v1816_v24  ;;  %v1497_v57 = vld [vmem:[%s2453_s8 + $0xb0] sm:$0xf0] }
  0x61   : > { %v1799_v26 = vld [vmem:[%s2453_s8 + $0x300] sm:$0xf]  ;;  %v2030_v27 = vld [vmem:[%s2453_s8 + $0x30c] sm:$0xf0]  ;;  %v1672_v36 = vor.u32 %v1998_v25, %v1671_v23  ;;  %1041 = vmatpush.bf16.msra.mxu0 %v1416_v31  ;;  %v1984_v58 = vld [vmem:[%s2453_s8 + $0x1a4] sm:$0xf]  ;;  %v1500_v1 = vor.u32 %v1952_v56, %v1497_v57 }
  0x62   : > { %v1800_v39 = vor.u32 %v2030_v27, %v1799_v26  ;;  %1054 = vmatpush.bf16.msra.mxu1 %v1544_v35  ;;  %v1625_v60 = vld [vmem:[%s2453_s8 + $0x1b0] sm:$0xf0]  ;;  %v2016_v61 = vld [vmem:[%s2453_s8 + $0x2a4] sm:$0xf] }
  0x63   : > { %1067 = vmatpush.bf16.msra.mxu2 %v1672_v36  ;;  %v1753_v62 = vld [vmem:[%s2453_s8 + $0x2b0] sm:$0xf0]  ;;  %v2048_v63 = vld [vmem:[%s2453_s8 + $0x3a4] sm:$0xf]  ;;  %v1628_v3 = vor.u32 %v1984_v58, %v1625_v60 }
  0x64   : > { %1080 = vmatpush.bf16.msra.mxu3 %v1800_v39  ;;  %v1881_v0 = vld [vmem:[%s2453_s8 + $0x3b0] sm:$0xf0]  ;;  %v1948_v2 = vld [vmem:[%s2453_s8 + $0x84] sm:$0xf]  ;;  %v1756_v4 = vor.u32 %v2016_v61, %v1753_v62 }
  0x65   : > { %1086 = vmatpush.bf16.msrb.mxu0 %v1532_v40  ;;  %v1481_v5 = vld [vmem:[%s2453_s8 + $0x90] sm:$0xf0]  ;;  %v1980_v6 = vld [vmem:[%s2453_s8 + $0x184] sm:$0xf]  ;;  %v1884_v8 = vor.u32 %v2048_v63, %v1881_v0 }
  0x66   : > { %1099 = vmatpush.bf16.msrb.mxu1 %v1660_v41  ;;  %v1609_v7 = vld [vmem:[%s2453_s8 + $0x190] sm:$0xf0]  ;;  %v2012_v9 = vld [vmem:[%s2453_s8 + $0x284] sm:$0xf]  ;;  %v1484_v15 = vor.u32 %v1948_v2, %v1481_v5  ;;  %v1963_v2 = vld [vmem:[%s2453_s8 + $0xf4] sm:$0xf0] }
  0x67   : > { %1112 = vmatpush.bf16.msrb.mxu2 %v1788_v42  ;;  %v1737_v10 = vld [vmem:[%s2453_s8 + $0x290] sm:$0xf0]  ;;  %v2044_v11 = vld [vmem:[%s2453_s8 + $0x384] sm:$0xf]  ;;  %v1612_v18 = vor.u32 %v1980_v6, %v1609_v7  ;;  %v1995_v5 = vld [vmem:[%s2453_s8 + $0x1f4] sm:$0xf0] }
  0x68   : > { %1125 = vmatpush.bf16.msrb.mxu3 %v1916_v46  ;;  %v1865_v12 = vld [vmem:[%s2453_s8 + $0x390] sm:$0xf0]  ;;  %v2555_v13 = vld [vmem:[#allocation1 + $0x12] sm:$0xff]  ;;  %v2562_v17 = vld [vmem:[#allocation1 + $0x9] sm:$0xff]  ;;  %v1740_v19 = vor.u32 %v2012_v9, %v1737_v10 }
  0x69   : > { %1087 = vmatpush.bf16.msrb.mxu0 %v1516_v53  ;;  %v2557_v14 = vld [vmem:[#allocation1] sm:$0xff]  ;;  %1068 = vmatmul.bf16.vlgmr.msra.gmra.mxu2 %v2555_v13  ;;  %v1944_v20 = vld [vmem:[%s2453_s8 + $0x64] sm:$0xf]  ;;  %v1868_v23 = vor.u32 %v2044_v11, %v1865_v12  ;;  %v1791_v6 = vld [vmem:[%s2453_s8 + $0x2e8] sm:$0xf] }
  0x6a   : > { %1100 = vmatpush.bf16.msrb.mxu1 %v1644_v54  ;;  %v2560_v16 = vld [vmem:[#allocation1 + $0x1b] sm:$0xff]  ;;  %v1976_v22 = vld [vmem:[%s2453_s8 + $0x164] sm:$0xf]  ;;  %1042 = vmatmul.bf16.vlgmr.msra.gmra.mxu0 %v2557_v14  ;;  %v2027_v7 = vld [vmem:[%s2453_s8 + $0x2f4] sm:$0xf0] }
  0x6b   : > { %1113 = vmatpush.bf16.msrb.mxu2 %v1772_v55  ;;  %v1465_v21 = vld [vmem:[%s2453_s8 + $0x70] sm:$0xf0]  ;;  %v2008_v25 = vld [vmem:[%s2453_s8 + $0x264] sm:$0xf]  ;;  %1081 = vmatmul.bf16.vlgmr.msra.gmra.mxu3 %v2560_v16  ;;  %v1919_v10 = vld [vmem:[%s2453_s8 + $0x3e8] sm:$0xf] }
  0x6c   : > { %1126 = vmatpush.bf16.msrb.mxu3 %v1900_v59  ;;  %v1593_v24 = vld [vmem:[%s2453_s8 + $0x170] sm:$0xf0]  ;;  %v2040_v27 = vld [vmem:[%s2453_s8 + $0x364] sm:$0xf]  ;;  %1055 = vmatmul.bf16.vlgmr.msra.gmra.mxu1 %v2562_v17  ;;  %v1468_v29 = vor.u32 %v1944_v20, %v1465_v21  ;;  %v2059_v11 = vld [vmem:[%s2453_s8 + $0x3f4] sm:$0xf0] }
  0x6d   : > { %1088 = vmatpush.bf16.msrb.mxu0 %v1500_v1  ;;  %v1721_v26 = vld [vmem:[%s2453_s8 + $0x270] sm:$0xf0]  ;;  %v1596_v30 = vor.u32 %v1976_v22, %v1593_v24  ;;  %v1940_v32 = vld [vmem:[%s2453_s8 + $0x44] sm:$0xf]  ;;  %v1535_v1 = vld [vmem:[%s2453_s8 + $0xe8] sm:$0xf] }
  0x6e   : > { %1101 = vmatpush.bf16.msrb.mxu1 %v1628_v3  ;;  %v1849_v28 = vld [vmem:[%s2453_s8 + $0x370] sm:$0xf0]  ;;  %v1724_v31 = vor.u32 %v2008_v25, %v1721_v26  ;;  %v1972_v34 = vld [vmem:[%s2453_s8 + $0x144] sm:$0xf]  ;;  %v1663_v3 = vld [vmem:[%s2453_s8 + $0x1e8] sm:$0xf] }
  0x6f   : > { %1114 = vmatpush.bf16.msrb.mxu2 %v1756_v4  ;;  %v1449_v33 = vld [vmem:[%s2453_s8 + $0x50] sm:$0xf0]  ;;  %v1852_v35 = vor.u32 %v2040_v27, %v1849_v28  ;;  %v2004_v37 = vld [vmem:[%s2453_s8 + $0x244] sm:$0xf]  ;;  %v1519_v20 = vld [vmem:[%s2453_s8 + $0xc8] sm:$0xf] }
  0x70   : > { %1127 = vmatpush.bf16.msrb.mxu3 %v1884_v8  ;;  %v1577_v36 = vld [vmem:[%s2453_s8 + $0x150] sm:$0xf0]  ;;  %v2036_v39 = vld [vmem:[%s2453_s8 + $0x344] sm:$0xf]  ;;  %v1452_v41 = vor.u32 %v1940_v32, %v1449_v33  ;;  %v1959_v21 = vld [vmem:[%s2453_s8 + $0xd4] sm:$0xf0] }
  0x71   : > { %1089 = vmatpush.bf16.msrb.mxu0 %v1484_v15  ;;  %v1705_v38 = vld [vmem:[%s2453_s8 + $0x250] sm:$0xf0]  ;;  %v1580_v42 = vor.u32 %v1972_v34, %v1577_v36  ;;  %v1936_v44 = vld [vmem:[%s2453_s8 + $0x24] sm:$0xf]  ;;  %v1536_v15 = vor.u32 %v1963_v2, %v1535_v1  ;;  %v1647_v22 = vld [vmem:[%s2453_s8 + $0x1c8] sm:$0xf] }
  0x72   : > { %1102 = vmatpush.bf16.msrb.mxu1 %v1612_v18  ;;  %v1833_v40 = vld [vmem:[%s2453_s8 + $0x350] sm:$0xf0]  ;;  %v1708_v43 = vor.u32 %v2004_v37, %v1705_v38  ;;  %v1968_v46 = vld [vmem:[%s2453_s8 + $0x124] sm:$0xf]  ;;  %v1664_v18 = vor.u32 %v1995_v5, %v1663_v3  ;;  %v1991_v24 = vld [vmem:[%s2453_s8 + $0x1d4] sm:$0xf0] }
  0x73   : > { %1115 = vmatpush.bf16.msrb.mxu2 %v1740_v19  ;;  %v1433_v45 = vld [vmem:[%s2453_s8 + $0x30] sm:$0xf0]  ;;  %v1836_v47 = vor.u32 %v2036_v39, %v1833_v40  ;;  %v2000_v49 = vld [vmem:[%s2453_s8 + $0x224] sm:$0xf]  ;;  %v1792_v19 = vor.u32 %v2027_v7, %v1791_v6  ;;  %v1775_v25 = vld [vmem:[%s2453_s8 + $0x2c8] sm:$0xf] }
  0x74   : > { %1128 = vmatpush.bf16.msrb.mxu3 %v1868_v23  ;;  %v1561_v48 = vld [vmem:[%s2453_s8 + $0x130] sm:$0xf0]  ;;  %v2032_v51 = vld [vmem:[%s2453_s8 + $0x324] sm:$0xf]  ;;  %v1436_v53 = vor.u32 %v1936_v44, %v1433_v45  ;;  %v1920_v23 = vor.u32 %v2059_v11, %v1919_v10  ;;  %v2023_v26 = vld [vmem:[%s2453_s8 + $0x2d4] sm:$0xf0] }
  0x75   : > { %1090 = vmatpush.bf16.msrb.mxu0 %v1468_v29  ;;  %v1689_v50 = vld [vmem:[%s2453_s8 + $0x230] sm:$0xf0]  ;;  %v1932_v54 = vld [vmem:[%s2453_s8 + $0x4] sm:$0xf]  ;;  %v1564_v56 = vor.u32 %v1968_v46, %v1561_v48  ;;  %v1903_v27 = vld [vmem:[%s2453_s8 + $0x3c8] sm:$0xf]  ;;  %v1520_v29 = vor.u32 %v1959_v21, %v1519_v20 }
  0x76   : > { %1103 = vmatpush.bf16.msrb.mxu1 %v1596_v30  ;;  %v1817_v52 = vld [vmem:[%s2453_s8 + $0x330] sm:$0xf0]  ;;  %v1692_v57 = vor.u32 %v2000_v49, %v1689_v50  ;;  %v1964_v58 = vld [vmem:[%s2453_s8 + $0x104] sm:$0xf]  ;;  %v2055_v28 = vld [vmem:[%s2453_s8 + $0x3d4] sm:$0xf0]  ;;  %v1648_v30 = vor.u32 %v1991_v24, %v1647_v22 }
  0x77   : > { %1116 = vmatpush.bf16.msrb.mxu2 %v1724_v31  ;;  %v1417_v55 = vld [vmem:[%s2453_s8 + $0x10] sm:$0xf0]  ;;  %v1996_v60 = vld [vmem:[%s2453_s8 + $0x204] sm:$0xf]  ;;  %v1820_v61 = vor.u32 %v2032_v51, %v1817_v52  ;;  %v1776_v31 = vor.u32 %v2023_v26, %v1775_v25  ;;  %v1503_v32 = vld [vmem:[%s2453_s8 + $0xa8] sm:$0xf] }
  0x78   : > { %1129 = vmatpush.bf16.msrb.mxu3 %v1852_v35  ;;  %v1545_v59 = vld [vmem:[%s2453_s8 + $0x110] sm:$0xf0]  ;;  %v2028_v63 = vld [vmem:[%s2453_s8 + $0x304] sm:$0xf]  ;;  %v1420_v4 = vor.u32 %v1932_v54, %v1417_v55  ;;  %v1955_v33 = vld [vmem:[%s2453_s8 + $0xb4] sm:$0xf0]  ;;  %v1904_v35 = vor.u32 %v2055_v28, %v1903_v27 }
  0x79   : > { %1091 = vmatpush.bf16.msrb.mxu0 %v1452_v41  ;;  %v1673_v62 = vld [vmem:[%s2453_s8 + $0x210] sm:$0xf0]  ;;  %v1548_v8 = vor.u32 %v1964_v58, %v1545_v59  ;;  %v1631_v34 = vld [vmem:[%s2453_s8 + $0x1a8] sm:$0xf]  ;;  %v1987_v36 = vld [vmem:[%s2453_s8 + $0x1b4] sm:$0xf0]  ;;  %v1504_v41 = vor.u32 %v1955_v33, %v1503_v32 }
  0x7a   : > { %1104 = vmatpush.bf16.msrb.mxu1 %v1580_v42  ;;  %v1801_v0 = vld [vmem:[%s2453_s8 + $0x310] sm:$0xf0]  ;;  %v1676_v9 = vor.u32 %v1996_v60, %v1673_v62  ;;  %v1759_v37 = vld [vmem:[%s2453_s8 + $0x2a8] sm:$0xf]  ;;  %v2019_v38 = vld [vmem:[%s2453_s8 + $0x2b4] sm:$0xf0]  ;;  %v1632_v42 = vor.u32 %v1987_v36, %v1631_v34 }
  0x7b   : > { %1117 = vmatpush.bf16.msrb.mxu2 %v1708_v43  ;;  %v1804_v12 = vor.u32 %v2028_v63, %v1801_v0  ;;  %v1887_v39 = vld [vmem:[%s2453_s8 + $0x3a8] sm:$0xf]  ;;  %v2051_v40 = vld [vmem:[%s2453_s8 + $0x3b4] sm:$0xf0]  ;;  %v1760_v43 = vor.u32 %v2019_v38, %v1759_v37 }
  0x7c   : > { %1130 = vmatpush.bf16.msrb.mxu3 %v1836_v47  ;;  %v1487_v44 = vld [vmem:[%s2453_s8 + $0x88] sm:$0xf]  ;;  %v1951_v45 = vld [vmem:[%s2453_s8 + $0x94] sm:$0xf0]  ;;  %v1888_v47 = vor.u32 %v2051_v40, %v1887_v39 }
  0x7d   : > { %1092 = vmatpush.bf16.msrb.mxu0 %v1436_v53  ;;  %v1615_v46 = vld [vmem:[%s2453_s8 + $0x188] sm:$0xf]  ;;  %v1983_v48 = vld [vmem:[%s2453_s8 + $0x194] sm:$0xf0]  ;;  %v1488_v53 = vor.u32 %v1951_v45, %v1487_v44  ;;  %v1665_v45 = vld [vmem:[%s2453_s8 + $0x1f8] sm:$0xf0] }
  0x7e   : > { %1105 = vmatpush.bf16.msrb.mxu1 %v1564_v56  ;;  %v1743_v49 = vld [vmem:[%s2453_s8 + $0x288] sm:$0xf]  ;;  %v2015_v50 = vld [vmem:[%s2453_s8 + $0x294] sm:$0xf0]  ;;  %v1616_v54 = vor.u32 %v1983_v48, %v1615_v46  ;;  %v2025_v46 = vld [vmem:[%s2453_s8 + $0x2ec] sm:$0xf] }
  0x7f   : > { %1118 = vmatpush.bf16.msrb.mxu2 %v1692_v57  ;;  %v1871_v51 = vld [vmem:[%s2453_s8 + $0x388] sm:$0xf]  ;;  %v2047_v52 = vld [vmem:[%s2453_s8 + $0x394] sm:$0xf0]  ;;  %v1744_v55 = vor.u32 %v2015_v50, %v1743_v49  ;;  %v2057_v50 = vld [vmem:[%s2453_s8 + $0x3ec] sm:$0xf] }
  0x80   : > { %1131 = vmatpush.bf16.msrb.mxu3 %v1820_v61  ;;  %v1471_v56 = vld [vmem:[%s2453_s8 + $0x68] sm:$0xf]  ;;  %v1947_v57 = vld [vmem:[%s2453_s8 + $0x74] sm:$0xf0]  ;;  %v1872_v59 = vor.u32 %v2047_v52, %v1871_v51  ;;  %v1921_v51 = vld [vmem:[%s2453_s8 + $0x3f8] sm:$0xf0] }
  0x81   : > { %1093 = vmatpush.bf16.msrb.mxu0 %v1420_v4  ;;  %v1599_v58 = vld [vmem:[%s2453_s8 + $0x168] sm:$0xf]  ;;  %v1979_v60 = vld [vmem:[%s2453_s8 + $0x174] sm:$0xf0]  ;;  %v1472_v1 = vor.u32 %v1947_v57, %v1471_v56  ;;  %v1957_v56 = vld [vmem:[%s2453_s8 + $0xcc] sm:$0xf] }
  0x82   : > { %1106 = vmatpush.bf16.msrb.mxu1 %v1548_v8  ;;  %v1727_v61 = vld [vmem:[%s2453_s8 + $0x268] sm:$0xf]  ;;  %v2011_v62 = vld [vmem:[%s2453_s8 + $0x274] sm:$0xf0]  ;;  %v1600_v2 = vor.u32 %v1979_v60, %v1599_v58  ;;  %v1521_v57 = vld [vmem:[%s2453_s8 + $0xd8] sm:$0xf0] }
  0x83   : > { %1119 = vmatpush.bf16.msrb.mxu2 %v1676_v9  ;;  %v1855_v63 = vld [vmem:[%s2453_s8 + $0x368] sm:$0xf]  ;;  %v2043_v0 = vld [vmem:[%s2453_s8 + $0x374] sm:$0xf0]  ;;  %v1728_v3 = vor.u32 %v2011_v62, %v1727_v61  ;;  %v1989_v58 = vld [vmem:[%s2453_s8 + $0x1cc] sm:$0xf] }
  0x84   : > { %1132 = vmatpush.bf16.msrb.mxu3 %v1804_v12  ;;  %1094 = vmatmul.bf16.vlgmr.msrb.gmra.mxu0 %v2557_v14  ;;  %v1455_v4 = vld [vmem:[%s2453_s8 + $0x48] sm:$0xf]  ;;  %v1943_v5 = vld [vmem:[%s2453_s8 + $0x54] sm:$0xf0]  ;;  %v1856_v7 = vor.u32 %v2043_v0, %v1855_v63  ;;  %v1649_v60 = vld [vmem:[%s2453_s8 + $0x1d8] sm:$0xf0] }
  0x85   : > { %1138 = vmatpush.bf16.msra.mxu0 %v1536_v15  ;;  %1107 = vmatmul.bf16.vlgmr.msrb.gmra.mxu1 %v2562_v17  ;;  %v1583_v6 = vld [vmem:[%s2453_s8 + $0x148] sm:$0xf]  ;;  %v1975_v8 = vld [vmem:[%s2453_s8 + $0x154] sm:$0xf0]  ;;  %v1456_v15 = vor.u32 %v1943_v5, %v1455_v4  ;;  %v2021_v61 = vld [vmem:[%s2453_s8 + $0x2cc] sm:$0xf] }
  0x86   : > { %1151 = vmatpush.bf16.msra.mxu1 %v1664_v18  ;;  %1120 = vmatmul.bf16.vlgmr.msrb.gmra.mxu2 %v2555_v13  ;;  %v1711_v9 = vld [vmem:[%s2453_s8 + $0x248] sm:$0xf]  ;;  %v2007_v10 = vld [vmem:[%s2453_s8 + $0x254] sm:$0xf0]  ;;  %v1584_v18 = vor.u32 %v1975_v8, %v1583_v6  ;;  %v1777_v62 = vld [vmem:[%s2453_s8 + $0x2d8] sm:$0xf0] }
  0x87   : > { %1164 = vmatpush.bf16.msra.mxu2 %v1792_v19  ;;  %1133 = vmatmul.bf16.vlgmr.msrb.gmra.mxu3 %v2560_v16  ;;  %v1839_v11 = vld [vmem:[%s2453_s8 + $0x348] sm:$0xf]  ;;  %v2039_v12 = vld [vmem:[%s2453_s8 + $0x354] sm:$0xf0]  ;;  %v1712_v19 = vor.u32 %v2007_v10, %v1711_v9  ;;  %v2053_v63 = vld [vmem:[%s2453_s8 + $0x3cc] sm:$0xf] }
  0x88   : > { %1177 = vmatpush.bf16.msra.mxu3 %v1920_v23  ;;  %v1439_v20 = vld [vmem:[%s2453_s8 + $0x28] sm:$0xf]  ;;  %v1939_v21 = vld [vmem:[%s2453_s8 + $0x34] sm:$0xf0]  ;;  %v1840_v23 = vor.u32 %v2039_v12, %v1839_v11  ;;  %v1905_v0 = vld [vmem:[%s2453_s8 + $0x3d8] sm:$0xf0] }
  0x89   : > { %1139 = vmatpush.bf16.msra.mxu0 %v1520_v29  ;;  %v1567_v22 = vld [vmem:[%s2453_s8 + $0x128] sm:$0xf]  ;;  %v1971_v24 = vld [vmem:[%s2453_s8 + $0x134] sm:$0xf0]  ;;  %v1440_v29 = vor.u32 %v1939_v21, %v1439_v20  ;;  %v1953_v4 = vld [vmem:[%s2453_s8 + $0xac] sm:$0xf] }
  0x8a   : > { %1152 = vmatpush.bf16.msra.mxu1 %v1648_v30  ;;  %v1695_v25 = vld [vmem:[%s2453_s8 + $0x228] sm:$0xf]  ;;  %v2003_v26 = vld [vmem:[%s2453_s8 + $0x234] sm:$0xf0]  ;;  %v1568_v32 = vor.u32 %v1971_v24, %v1567_v22  ;;  %v1505_v5 = vld [vmem:[%s2453_s8 + $0xb8] sm:$0xf0] }
  0x8b   : > { %1165 = vmatpush.bf16.msra.mxu2 %v1776_v31  ;;  %v1823_v27 = vld [vmem:[%s2453_s8 + $0x328] sm:$0xf]  ;;  %v2035_v28 = vld [vmem:[%s2453_s8 + $0x334] sm:$0xf0]  ;;  %v1696_v33 = vor.u32 %v2003_v26, %v1695_v25  ;;  %v1985_v6 = vld [vmem:[%s2453_s8 + $0x1ac] sm:$0xf] }
  0x8c   : > { %1178 = vmatpush.bf16.msra.mxu3 %v1904_v35  ;;  %v1423_v30 = vld [vmem:[%s2453_s8 + $0x8] sm:$0xf]  ;;  %v1935_v31 = vld [vmem:[%s2453_s8 + $0x14] sm:$0xf0]  ;;  %v1824_v37 = vor.u32 %v2035_v28, %v1823_v27  ;;  %v1633_v8 = vld [vmem:[%s2453_s8 + $0x1b8] sm:$0xf0] }
  0x8d   : > { %1140 = vmatpush.bf16.msra.mxu0 %v1504_v41  ;;  %v1551_v34 = vld [vmem:[%s2453_s8 + $0x108] sm:$0xf]  ;;  %v1967_v35 = vld [vmem:[%s2453_s8 + $0x114] sm:$0xf0]  ;;  %v1961_v41 = vld [vmem:[%s2453_s8 + $0xec] sm:$0xf]  ;;  %v1424_v44 = vor.u32 %v1935_v31, %v1423_v30 }
  0x8e   : > { %1153 = vmatpush.bf16.msra.mxu1 %v1632_v42  ;;  %v1679_v36 = vld [vmem:[%s2453_s8 + $0x208] sm:$0xf]  ;;  %v1999_v38 = vld [vmem:[%s2453_s8 + $0x214] sm:$0xf0]  ;;  %v1537_v42 = vld [vmem:[%s2453_s8 + $0xf8] sm:$0xf0]  ;;  %v1552_v48 = vor.u32 %v1967_v35, %v1551_v34 }
  0x8f   : > { %1166 = vmatpush.bf16.msra.mxu2 %v1760_v43  ;;  %v1807_v39 = vld [vmem:[%s2453_s8 + $0x308] sm:$0xf]  ;;  %v2031_v40 = vld [vmem:[%s2453_s8 + $0x314] sm:$0xf0]  ;;  %v1993_v43 = vld [vmem:[%s2453_s8 + $0x1ec] sm:$0xf]  ;;  %v1680_v49 = vor.u32 %v1999_v38, %v1679_v36 }
  0x90   : > { %1179 = vmatpush.bf16.msra.mxu3 %v1888_v47  ;;  %v1793_v47 = vld [vmem:[%s2453_s8 + $0x2f8] sm:$0xf0]  ;;  %v1808_v52 = vor.u32 %v2031_v40, %v1807_v39  ;;  %v2017_v9 = vld [vmem:[%s2453_s8 + $0x2ac] sm:$0xf] }
  0x91   : > { %1141 = vmatpush.bf16.msra.mxu0 %v1488_v53  ;;  %v1540_v53 = vor.u32 %v1961_v41, %v1537_v42  ;;  %v1761_v10 = vld [vmem:[%s2453_s8 + $0x2b8] sm:$0xf0]  ;;  %v2049_v11 = vld [vmem:[%s2453_s8 + $0x3ac] sm:$0xf] }
  0x92   : > { %1154 = vmatpush.bf16.msra.mxu1 %v1616_v54  ;;  %v1668_v54 = vor.u32 %v1993_v43, %v1665_v45  ;;  %v1889_v12 = vld [vmem:[%s2453_s8 + $0x3b8] sm:$0xf0]  ;;  %v1949_v20 = vld [vmem:[%s2453_s8 + $0x8c] sm:$0xf] }
  0x93   : > { %1167 = vmatpush.bf16.msra.mxu2 %v1744_v55  ;;  %v1796_v55 = vor.u32 %v2025_v46, %v1793_v47  ;;  %v1489_v21 = vld [vmem:[%s2453_s8 + $0x98] sm:$0xf0]  ;;  %v1981_v22 = vld [vmem:[%s2453_s8 + $0x18c] sm:$0xf] }
  0x94   : > { %1180 = vmatpush.bf16.msra.mxu3 %v1872_v59  ;;  %v1924_v59 = vor.u32 %v2057_v50, %v1921_v51  ;;  %v1617_v24 = vld [vmem:[%s2453_s8 + $0x198] sm:$0xf0]  ;;  %v2013_v25 = vld [vmem:[%s2453_s8 + $0x28c] sm:$0xf] }
  0x95   : > { %1142 = vmatpush.bf16.msra.mxu0 %v1472_v1  ;;  %v1524_v1 = vor.u32 %v1957_v56, %v1521_v57  ;;  %v1745_v26 = vld [vmem:[%s2453_s8 + $0x298] sm:$0xf0]  ;;  %v2045_v27 = vld [vmem:[%s2453_s8 + $0x38c] sm:$0xf]  ;;  %v1620_v30 = vor.u32 %v1981_v22, %v1617_v24 }
  0x96   : > { %1155 = vmatpush.bf16.msra.mxu1 %v1600_v2  ;;  %v1652_v2 = vor.u32 %v1989_v58, %v1649_v60  ;;  %v1873_v28 = vld [vmem:[%s2453_s8 + $0x398] sm:$0xf0]  ;;  %v1748_v31 = vor.u32 %v2013_v25, %v1745_v26  ;;  %v1977_v34 = vld [vmem:[%s2453_s8 + $0x16c] sm:$0xf] }
  0x97   : > { %1168 = vmatpush.bf16.msra.mxu2 %v1728_v3  ;;  %v1780_v3 = vor.u32 %v2021_v61, %v1777_v62  ;;  %v1876_v35 = vor.u32 %v2045_v27, %v1873_v28  ;;  %v1601_v36 = vld [vmem:[%s2453_s8 + $0x178] sm:$0xf0]  ;;  %v2041_v39 = vld [vmem:[%s2453_s8 + $0x36c] sm:$0xf] }
  0x98   : > { %1181 = vmatpush.bf16.msra.mxu3 %v1856_v7  ;;  %v1908_v7 = vor.u32 %v2053_v63, %v1905_v0  ;;  %v1729_v38 = vld [vmem:[%s2453_s8 + $0x278] sm:$0xf0]  ;;  %v1604_v42 = vor.u32 %v1977_v34, %v1601_v36  ;;  %v1973_v46 = vld [vmem:[%s2453_s8 + $0x14c] sm:$0xf] }
  0x99   : > { %1143 = vmatpush.bf16.msra.mxu0 %v1456_v15  ;;  %v1508_v15 = vor.u32 %v1953_v4, %v1505_v5  ;;  %v1857_v40 = vld [vmem:[%s2453_s8 + $0x378] sm:$0xf0]  ;;  %v2037_v51 = vld [vmem:[%s2453_s8 + $0x34c] sm:$0xf] }
  0x9a   : > { %1156 = vmatpush.bf16.msra.mxu1 %v1584_v18  ;;  %v1636_v18 = vor.u32 %v1985_v6, %v1633_v8  ;;  %v1457_v45 = vld [vmem:[%s2453_s8 + $0x58] sm:$0xf0]  ;;  %v1860_v47 = vor.u32 %v2041_v39, %v1857_v40  ;;  %v1937_v56 = vld [vmem:[%s2453_s8 + $0x2c] sm:$0xf] }
  0x9b   : > { %1169 = vmatpush.bf16.msra.mxu2 %v1712_v19  ;;  %v1764_v19 = vor.u32 %v2017_v9, %v1761_v10  ;;  %v1713_v50 = vld [vmem:[%s2453_s8 + $0x258] sm:$0xf0]  ;;  %v1969_v58 = vld [vmem:[%s2453_s8 + $0x12c] sm:$0xf] }
  0x9c   : > { %1182 = vmatpush.bf16.msra.mxu3 %v1840_v23  ;;  %v1892_v23 = vor.u32 %v2049_v11, %v1889_v12  ;;  %v1441_v57 = vld [vmem:[%s2453_s8 + $0x38] sm:$0xf0]  ;;  %v2001_v61 = vld [vmem:[%s2453_s8 + $0x22c] sm:$0xf] }
  0x9d   : > { %1144 = vmatpush.bf16.msra.mxu0 %v1440_v29  ;;  %v1492_v29 = vor.u32 %v1949_v20, %v1489_v21  ;;  %v1569_v60 = vld [vmem:[%s2453_s8 + $0x138] sm:$0xf0]  ;;  %v2033_v63 = vld [vmem:[%s2453_s8 + $0x32c] sm:$0xf]  ;;  %v374_v21 = vld [vmem:[%s213_s24] sm:$0xf] }
  0x9e   : > { %1157 = vmatpush.bf16.msra.mxu1 %v1568_v32  ;;  %v1945_v32 = vld [vmem:[%s2453_s8 + $0x6c] sm:$0xf]  ;;  %v1697_v62 = vld [vmem:[%s2453_s8 + $0x238] sm:$0xf0]  ;;  %v376_v22 = vperm.slane %v374_v21, 0 }
  0x9f   : > { %1170 = vmatpush.bf16.msra.mxu2 %v1696_v33  ;;  %v1473_v33 = vld [vmem:[%s2453_s8 + $0x78] sm:$0xf0]  ;;  %v1933_v4 = vld [vmem:[%s2453_s8 + $0xc] sm:$0xf] }
  0xa0   : > { %1183 = vmatpush.bf16.msra.mxu3 %v1824_v37  ;;  %v2009_v37 = vld [vmem:[%s2453_s8 + $0x26c] sm:$0xf]  ;;  %v1476_v41 = vor.u32 %v1945_v32, %v1473_v33  ;;  %v1825_v0 = vld [vmem:[%s2453_s8 + $0x338] sm:$0xf0] }
  0xa1   : > { %1145 = vmatpush.bf16.msra.mxu0 %v1424_v44  ;;  %v1732_v43 = vor.u32 %v2009_v37, %v1729_v38  ;;  %v1941_v44 = vld [vmem:[%s2453_s8 + $0x4c] sm:$0xf]  ;;  %v1425_v5 = vld [vmem:[%s2453_s8 + $0x18] sm:$0xf0] }
  0xa2   : > { %1158 = vmatpush.bf16.msra.mxu1 %v1552_v48  ;;  %v1585_v48 = vld [vmem:[%s2453_s8 + $0x158] sm:$0xf0]  ;;  %v1965_v6 = vld [vmem:[%s2453_s8 + $0x10c] sm:$0xf] }
  0xa3   : > { %1171 = vmatpush.bf16.msra.mxu2 %v1680_v49  ;;  %v2005_v49 = vld [vmem:[%s2453_s8 + $0x24c] sm:$0xf]  ;;  %v1553_v8 = vld [vmem:[%s2453_s8 + $0x118] sm:$0xf0] }
  0xa4   : > { %1184 = vmatpush.bf16.msra.mxu3 %v1808_v52  ;;  %1146 = vmatmul.bf16.vlgmr.msra.gmra.mxu0 %v2557_v14  ;;  %v1841_v52 = vld [vmem:[%s2453_s8 + $0x358] sm:$0xf0]  ;;  %v1997_v9 = vld [vmem:[%s2453_s8 + $0x20c] sm:$0xf] }
  0xa5   : > { %1190 = vmatpush.bf16.msrb.mxu0 %v1540_v53  ;;  %1159 = vmatmul.bf16.vlgmr.msra.gmra.mxu1 %v2562_v17  ;;  %v1460_v53 = vor.u32 %v1941_v44, %v1457_v45  ;;  %v1681_v10 = vld [vmem:[%s2453_s8 + $0x218] sm:$0xf0]  ;;  %v2029_v11 = vld [vmem:[%s2453_s8 + $0x30c] sm:$0xf] }
  0xa6   : > { %1203 = vmatpush.bf16.msrb.mxu1 %v1668_v54  ;;  %1172 = vmatmul.bf16.vlgmr.msra.gmra.mxu2 %v2555_v13  ;;  %v1588_v54 = vor.u32 %v1973_v46, %v1585_v48  ;;  %v1809_v12 = vld [vmem:[%s2453_s8 + $0x318] sm:$0xf0]  ;;  %v377_v46 = vperm.slane %v374_v21, 1  ;;  %v378_v48 = vperm.slane %v374_v21, 2 }
  0xa7   : > { %1216 = vmatpush.bf16.msrb.mxu2 %v1796_v55  ;;  %1185 = vmatmul.bf16.vlgmr.msra.gmra.mxu3 %v2560_v16  ;;  %v1716_v55 = vor.u32 %v2005_v49, %v1713_v50  ;;  %v1812_v20 = vor.u32 %v2029_v11, %v1809_v12 }
  0xa8   : > { %1229 = vmatpush.bf16.msrb.mxu3 %v1924_v59  ;;  %v1844_v59 = vor.u32 %v2037_v51, %v1841_v52 }
  0xa9   : > { %1191 = vmatpush.bf16.msrb.mxu0 %v1524_v1  ;;  %v1444_v1 = vor.u32 %v1937_v56, %v1441_v57 }
  0xaa   : > { %1204 = vmatpush.bf16.msrb.mxu1 %v1652_v2  ;;  %v1572_v2 = vor.u32 %v1969_v58, %v1569_v60 }
  0xab   : > { %1217 = vmatpush.bf16.msrb.mxu2 %v1780_v3  ;;  %v1700_v3 = vor.u32 %v2001_v61, %v1697_v62 }
  0xac   : > { %1230 = vmatpush.bf16.msrb.mxu3 %v1908_v7  ;;  %v1828_v7 = vor.u32 %v2033_v63, %v1825_v0 }
  0xad   : > { %1192 = vmatpush.bf16.msrb.mxu0 %v1508_v15  ;;  %v1428_v15 = vor.u32 %v1933_v4, %v1425_v5 }
  0xae   : > { %1205 = vmatpush.bf16.msrb.mxu1 %v1636_v18  ;;  %v1556_v18 = vor.u32 %v1965_v6, %v1553_v8 }
  0xaf   : > { %1218 = vmatpush.bf16.msrb.mxu2 %v1764_v19  ;;  %v1684_v19 = vor.u32 %v1997_v9, %v1681_v10 }
  0xb0   : > { %1231 = vmatpush.bf16.msrb.mxu3 %v1892_v23 }
  0xb1   : > { %1193 = vmatpush.bf16.msrb.mxu0 %v1492_v29 }
  0xb2   : > { %1206 = vmatpush.bf16.msrb.mxu1 %v1620_v30 }
  0xb3   : > { %1219 = vmatpush.bf16.msrb.mxu2 %v1748_v31 }
  0xb4   : > { %1232 = vmatpush.bf16.msrb.mxu3 %v1876_v35 }
  0xb5   : > { %1194 = vmatpush.bf16.msrb.mxu0 %v1476_v41 }
  0xb6   : > { %1207 = vmatpush.bf16.msrb.mxu1 %v1604_v42 }
  0xb7   : > { %1220 = vmatpush.bf16.msrb.mxu2 %v1732_v43 }
  0xb8   : > { %1233 = vmatpush.bf16.msrb.mxu3 %v1860_v47 }
  0xb9   : > { %1195 = vmatpush.bf16.msrb.mxu0 %v1460_v53  ;;  %v379_v53 = vperm.slane %v374_v21, 3 }
  0xba   : > { %1208 = vmatpush.bf16.msrb.mxu1 %v1588_v54  ;;  %v1243_v54 = vlaneseq }
  0xbb   : > { %1221 = vmatpush.bf16.msrb.mxu2 %v1716_v55 }
  0xbc   : > { %1234 = vmatpush.bf16.msrb.mxu3 %v1844_v59  ;;  %v1244_v60 = vand.u32 127, %v1243_v54 }
  0xbd   : > { %1196 = vmatpush.bf16.msrb.mxu0 %v1444_v1 }
  0xbe   : > { %1209 = vmatpush.bf16.msrb.mxu1 %v1572_v2  ;;  %v1245_v62 = vadd.s32 128, %v1244_v60  ;;  %v1246_v1 = vadd.s32 256, %v1244_v60  ;;  %v1248_v2 = vstv %s1925_s5 }
  0xbf   : > { %1222 = vmatpush.bf16.msrb.mxu2 %v1700_v3 }
  0xc0   : > { %1235 = vmatpush.bf16.msrb.mxu3 %v1828_v7  ;;  %v1250_v4 = vadd.s32 %v1248_v2, %v1245_v62  ;;  %v1247_v7 = vadd.s32 384, %v1244_v60  ;;  %v1251_v10 = vadd.s32 %v1248_v2, %v1246_v1 }
  0xc1   : > { %1197 = vmatpush.bf16.msrb.mxu0 %v1428_v15 }
  0xc2   : > { %1210 = vmatpush.bf16.msrb.mxu1 %v1556_v18  ;;  %vm1254_vm0 = vcmp.lt.s32.totalorder %v1250_v4, 256  ;;  %v1252_v15 = vadd.s32 %v1248_v2, %v1247_v7  ;;  %vm1255_vm1 = vcmp.lt.s32.totalorder %v1251_v10, 256 }
  0xc3   : > { %1223 = vmatpush.bf16.msrb.mxu2 %v1684_v19  ;;  %v1249_v19 = vadd.s32 %v1248_v2, %v1244_v60 }
  0xc4   : > { %1236 = vmatpush.bf16.msrb.mxu3 %v1812_v20  ;;  %1198 = vmatmul.bf16.vlgmr.msrb.gmra.mxu0 %v2557_v14  ;;  %vm1256_vm2 = vcmp.lt.s32.totalorder %v1252_v15, 256 }
  0xc5   : > { %1211 = vmatmul.bf16.vlgmr.msrb.gmra.mxu1 %v2562_v17  ;;  %vm1253_vm3 = vcmp.lt.s32.totalorder %v1249_v19, 256 }
  0xc6   : > { %1224 = vmatmul.bf16.vlgmr.msrb.gmra.mxu2 %v2555_v13 }
  0xc7   : > { %1237 = vmatmul.bf16.vlgmr.msrb.gmra.mxu3 %v2560_v16 }
  0xe7   : > { %v1043_v23 = vpop.f32.mrf.mxu0 }
  0xe8   : > { %v1044_v24 = vadd.f32 %v1043_v23, %v376_v22 }
  0xe9   : > { %v1056_v25 = vpop.f32.mrf.mxu1 }
  0xea   : > { %v1057_v26 = vadd.f32 %v1056_v25, %v1044_v24 }
  0xec   : > { %v1069_v27 = vpop.f32.mrf.mxu2 }
  0xed   : > { %v1070_v28 = vadd.f32 %v1069_v27, %v1057_v26 }
  0xee   : > { %v1082_v29 = vpop.f32.mrf.mxu3 }
  0xef   : > { %v2740_v30 = vadd.f32 %v1082_v29, %v1070_v28  ;;  %v1045_v14 = vpop.f32.mrf.mxu0 }
  0xf1   : > { %v1058_v31 = vpop.f32.mrf.mxu1 }
  0xf4   : > { %v1071_v17 = vpop.f32.mrf.mxu2 }
  0xf6   : > { %v1084_v32 = vpop.f32.mrf.mxu3 }
 0x101   : > { %v1095_v13 = vpop.f32.mrf.mxu0 }
 0x102   : > { %v1108_v33 = vpop.f32.mrf.mxu1  ;;  %v1096_v49 = vadd.f32 %v1095_v13, %v377_v46 }
 0x104   : > { %v1109_v51 = vadd.f32 %v1108_v33, %v1096_v49 }
 0x109   : > { %v1121_v16 = vpop.f32.mrf.mxu2  ;;  %v1097_v35 = vpop.f32.mrf.mxu0 }
 0x10a   : > { %v1134_v34 = vpop.f32.mrf.mxu3  ;;  %v1110_v36 = vpop.f32.mrf.mxu1  ;;  %v1122_v55 = vadd.f32 %v1121_v16, %v1109_v51 }
 0x10c   : > { %v1135_v61 = vadd.f32 %v1134_v34, %v1122_v55 }
 0x10e   : > { %2126 = vtanh.f32 %v1135_v61 }
 0x111   : > { %v1123_v37 = vpop.f32.mrf.mxu2 }
 0x112   : > { %v1136_v38 = vpop.f32.mrf.mxu3 }
 0x114   : > { %v2127_v12 = vpop.eup %2126 }
 0x115   : > { %v1262_v20 = vsel %vm1254_vm0, %v2127_v12, %v1135_v61 }
 0x116   : > { %v1269_v26 = vrot.slane %v1262_v20, 6 }
 0x121   : > { %v1147_v39 = vpop.f32.mrf.mxu0 }
 0x122   : > { %v1160_v40 = vpop.f32.mrf.mxu1  ;;  %v1148_v50 = vadd.f32 %v1147_v39, %v378_v48 }
 0x124   : > { %v1161_v52 = vadd.f32 %v1160_v40, %v1148_v50 }
 0x129   : > { %v1173_v41 = vpop.f32.mrf.mxu2  ;;  %v1149_v43 = vpop.f32.mrf.mxu0 }
 0x12a   : > { %v1186_v42 = vpop.f32.mrf.mxu3  ;;  %v1162_v44 = vpop.f32.mrf.mxu1  ;;  %v1174_v56 = vadd.f32 %v1173_v41, %v1161_v52 }
 0x12c   : > { %v1187_v63 = vadd.f32 %v1186_v42, %v1174_v56 }
 0x12e   : > { %2128 = vtanh.f32 %v1187_v63 }
 0x12f   : > { %2130 = vtanh.f32 %v2740_v30 }
 0x131   : > { %v1175_v45 = vpop.f32.mrf.mxu2 }
 0x132   : > { %v1188_v47 = vpop.f32.mrf.mxu3 }
 0x134   : > { %v2129_v18 = vpop.eup %2128 }
 0x135   : > { %v2131_v23 = vpop.eup %2130  ;;  %v1263_v24 = vsel %vm1255_vm1, %v2129_v18, %v1187_v63 }
 0x136   : > { %v1270_v28 = vrot.slane %v1263_v24, 4  ;;  %v1261_v14 = vsel %vm1253_vm3, %v2131_v23, %v2740_v30 }
 0x137   : > { %v1273_v31 = vsel %vm1272_vm4, %v1261_v14, %v1269_v26 }
 0x141   : > { %v1199_v57 = vpop.f32.mrf.mxu0 }
 0x142   : > { %v1200_v58 = vadd.f32 %v1199_v57, %v379_v53  ;;  %v1212_v59 = vpop.f32.mrf.mxu1 }
 0x144   : > { %v1213_v0 = vadd.f32 %v1212_v59, %v1200_v58 }
 0x149   : > { %v1225_v3 = vpop.f32.mrf.mxu2  ;;  %v1201_v8 = vpop.f32.mrf.mxu0 }
 0x14a   : > { %v1226_v5 = vadd.f32 %v1225_v3, %v1213_v0  ;;  %v1238_v6 = vpop.f32.mrf.mxu3  ;;  %v1214_v9 = vpop.f32.mrf.mxu1 }
 0x14c   : > { %v1239_v11 = vadd.f32 %v1238_v6, %v1226_v5 }
 0x14e   : > { %2132 = vtanh.f32 %v1239_v11 }
 0x151   : > { %v1227_v21 = vpop.f32.mrf.mxu2 }
 0x152   : > { %v1240_v22 = vpop.f32.mrf.mxu3 }
 0x154   : > { %v2133_v25 = vpop.eup %2132 }
 0x155   : > { %v1264_v27 = vsel %vm1256_vm2, %v2133_v25, %v1239_v11 }
 0x156   : > { %v1271_v29 = vrot.slane %v1264_v27, 2 }
 0x158   : > { %v1275_v17 = vsel %vm1274_vm5, %v1270_v28, %v1271_v29 }
 0x159   : > { %v1277_v32 = vsel %vm1276_vm6, %v1273_v31, %v1275_v17 }
 0x15a   : > { %1279 = vst [vmem:[%s241_s22] sm:$0xff] %v1277_v32 }
 0x15b   : > { %2251 = shalt.err (!%p2248_p3)
}
 0x15c   : > { %2069 = dma.vmem_to_hbm [thread:$0]  (%p2404_p9), %s1295_s21, 128, %s1297_s27, %s1281_s28  }
 0x15d PF: > { %p2089_p4 = scmp.ge.s32.totalorder %s2294_s15, 2  ;;  %s1308_s29 = sand.u32 1, %s2282_s12  }
 0x15e   : > { %s1309_s4 = scalar_lea.sflag [#allocation4], %s1308_s29 }
 0x15f   : > { %p2083_p6 = pnand %p2089_p4, %p2408_p10 }
 0x161   : > { %p2084_p11 = pneg %p2083_p6 }
 0x163   : > { %2277 = dma.done.wait (%p2084_p11), %s1309_s4, 128  }
 0x164   : > { %2279 = vsyncadd (%p2084_p11), %s1309_s4, 4294967168  ;;  %p17_p0 = scmp.ge.s32.totalorder %s2341_s16, 12   ;;  %s2789_s12 = smov %s2286_s13 }
 0x165   : > { %s2790_s13 = smov %s2290_s14  ;;  %s2791_s14 = smov %s2351_s19 }
 0x166   : > { %s2792_s15 = smov %s2341_s16  ;;  %19 = sbr.rel (!%p17_p0) target bundleno = 8 (0x8), region = 93 }
 0x16b   :  { %1315 = vsyncpa [#allocation3], 1 }
 0x16c   :  { %1317 = vsyncpa [#allocation3 + $0x1], 1 }
 0x16d   :  { %1318 = vsyncpa [#allocation6], 1 }
 0x16e   :  { %1320 = vsyncpa [#allocation6 + $0x1], 1 }
 0x16f   :  { %1321 = vsyncpa [#allocation4], 1 }
 0x170   :  { %1323 = vsyncpa [#allocation4 + $0x1], 1 }

</bundles_post_ra>
